<compile_context>
chip_gen: v6e
topology: v6e:2x2x1
jax: 0.10.0
libtpu: 0.0.40
codegen_flags: <defaults>
</compile_context>

<pallas_src>
import jax
import jax.numpy as jnp
from jax import lax
from jax.experimental import pallas as pl
from jax.experimental.pallas import tpu as pltpu


# ---------------------------------------------------------------------------
# Kernels
# ---------------------------------------------------------------------------

def lstm_recurrent_kernel(xproj_ref, whh_ref, h0_ref, c0_ref,
                          hid_ref, hn_ref, cn_ref,
                          h_sc, c_sc):
    """Runs T LSTM timesteps per grid step; (h, c) stay resident in VMEM scratch."""
    step = pl.program_id(0)
    H = whh_ref.shape[0]
    T = xproj_ref.shape[0]

    @pl.when(step == 0)
    def _():
        h_sc[...] = h0_ref[...]
        c_sc[...] = c0_ref[...]

    whh = whh_ref[...]                      # (H, 4H), single-buffered / resident

    def one_step(t, carry):
        h, c = carry
        # gates = x_proj_t + h @ W_hh^T      (input projection pre-computed)
        gates = xproj_ref[t] + jnp.dot(h, whh, preferred_element_type=jnp.float32)
        # PyTorch gate order: i, f, g, o.
        # NOTE: at H >= 128 these slices are lane-tile aligned and free; at the
        # demo H=32 the whole (B, 4H) fits one vreg so the masked selects are cheap.
        i_g = jax.nn.sigmoid(gates[:, 0 * H:1 * H])
        f_g = jax.nn.sigmoid(gates[:, 1 * H:2 * H])
        g_g = jnp.tanh(gates[:, 2 * H:3 * H])
        o_g = jax.nn.sigmoid(gates[:, 3 * H:4 * H])
        c = f_g * c + i_g * g_g
        h = o_g * jnp.tanh(c)
        hid_ref[t] = h                      # (B, H) slab for timestep t
        return h, c

    h, c = lax.fori_loop(0, T, one_step, (h_sc[...], c_sc[...]), unroll=True)
    h_sc[...] = h
    c_sc[...] = c

    # Final state: write only on the last grid step.
    @pl.when(step == pl.num_programs(0) - 1)
    def _():
        hn_ref[...] = h
        cn_ref[...] = c


def dense_kernel(h_ref, w_ref, b_ref, o_ref):
    """logits tile = hidden tile @ W_dense^T + b_dense  (parallel grid over rows)."""
    o_ref[...] = (jnp.dot(h_ref[...], w_ref[...], preferred_element_type=jnp.float32)
                  + b_ref[...])


# ---------------------------------------------------------------------------
# Wrapper
# ---------------------------------------------------------------------------

def _const_spec(shape):
    """Constant-index block: fetched once, kept resident with a single buffer."""
    n = len(shape)
    return pl.BlockSpec(shape, lambda i: (0,) * n, pipeline_mode=pl.Buffered(1))


def _pick_time_chunk(seq_len, max_chunk=64):
    if seq_len <= max_chunk:
        return seq_len
    for cand in range(max_chunk, 0, -1):
        if seq_len % cand == 0:
            return cand
    return 1


def _pick_row_tile(m, max_tile=512):
    if m <= max_tile:
        return m
    for cand in range(max_tile, 0, -8):     # multiples of 8 keep sublane tiling
        if m % cand == 0:
            return cand
    return m                                 # fall back to one full block


def rnn_model_forward(inputs, params, state=None, t_chunk=None):
    """inputs: (batch, seq) int32 tokens. Returns (output, (h_n, c_n))."""
    B, S = inputs.shape
    V = params["vocab_size"]
    H = params["hidden_size"]

    # Pre-transpose weights so every matmul is plain (in, out).
    wih_t = params["w_ih"].T                         # (V, 4H)
    whh_t = params["w_hh"].T                         # (H, 4H)
    bias = params["b_ih"] + params["b_hh"]           # (4H,)
    wd_t = params["w_dense"].T                       # (H, V)
    bd = params["b_dense"][None, :]                  # (1, V)

    # Input projection hoisted out of the recurrence:
    #   onehot(tok) @ W_ih^T  ==  W_ih^T[tok]   (embedding-row gather, no one-hot)
    tokens_tm = jnp.transpose(inputs)                            # (S, B)
    x_proj = (jnp.take(wih_t, tokens_tm, axis=0) + bias).astype(jnp.float32)  # (S,B,4H)

    if state is None:
        h0 = jnp.zeros((B, H), jnp.float32)
        c0 = jnp.zeros((B, H), jnp.float32)
    else:
        h0, c0 = state[0][0], state[1][0]

    if t_chunk is None:
        t_chunk = _pick_time_chunk(S)
    assert S % t_chunk == 0

    # ---- Sequential recurrent kernel: only (h, c) + W_hh^T live in the loop ----
    hidden, h_n, c_n = pl.pallas_call(
        lstm_recurrent_kernel,
        out_shape=(
            jax.ShapeDtypeStruct((S, B, H), jnp.float32),
            jax.ShapeDtypeStruct((B, H), jnp.float32),
            jax.ShapeDtypeStruct((B, H), jnp.float32),
        ),
        grid_spec=pltpu.PrefetchScalarGridSpec(
            num_scalar_prefetch=0,
            grid=(S // t_chunk,),
            in_specs=[
                pl.BlockSpec((t_chunk, B, 4 * H), lambda i: (i, 0, 0)),  # x_proj chunk
                _const_spec((H, 4 * H)),                                 # W_hh^T
                _const_spec((B, H)),                                     # h0
                _const_spec((B, H)),                                     # c0
            ],
            out_specs=[
                pl.BlockSpec((t_chunk, B, H), lambda i: (i, 0, 0)),      # hidden chunk
                pl.BlockSpec((B, H), lambda i: (0, 0)),                  # h_n
                pl.BlockSpec((B, H), lambda i: (0, 0)),                  # c_n
            ],
            scratch_shapes=[
                pltpu.VMEM((B, H), jnp.float32),   # h carry
                pltpu.VMEM((B, H), jnp.float32),   # c carry
            ],
        ),
        compiler_params=pltpu.CompilerParams(
            dimension_semantics=("arbitrary",)),   # recurrence must stay sequential
    )(x_proj, whh_t, h0, c0)

    # ---- Output Linear un-fused into one big parallel GEMM over M = S*B rows ----
    M = S * B
    h_flat = hidden.reshape(M, H)      # row-major, matches torch Y.view(-1, H)
    tm = _pick_row_tile(M)
    logits = pl.pallas_call(
        dense_kernel,
        out_shape=jax.ShapeDtypeStruct((M, V), jnp.float32),
        grid_spec=pltpu.PrefetchScalarGridSpec(
            num_scalar_prefetch=0,
            grid=(M // tm,),
            in_specs=[
                pl.BlockSpec((tm, H), lambda i: (i, 0)),
                _const_spec((H, V)),                   # W_dense^T
                _const_spec((1, V)),                   # b_dense
            ],
            out_specs=pl.BlockSpec((tm, V), lambda i: (i, 0)),
        ),
        compiler_params=pltpu.CompilerParams(
            dimension_semantics=("parallel",)),        # megacore-shardable
    )(h_flat, wd_t, bd)

    return logits, (h_n[None], c_n[None])


# ---------------------------------------------------------------------------
# Pure-JAX reference (matches torch.nn.LSTM + Linear semantics)
# ---------------------------------------------------------------------------

def reference_forward(inputs, params, state=None):
    B, S = inputs.shape
    V, H = params["vocab_size"], params["hidden_size"]
    x = jax.nn.one_hot(jnp.transpose(inputs), V, dtype=jnp.float32)  # (S, B, V)
    h = jnp.zeros((B, H), jnp.float32) if state is None else state[0][0]
    c = jnp.zeros((B, H), jnp.float32) if state is None else state[1][0]
    w_ih, w_hh = params["w_ih"], params["w_hh"]
    bias = params["b_ih"] + params["b_hh"]

    def step(carry, x_t):
        h, c = carry
        gates = x_t @ w_ih.T + h @ w_hh.T + bias
        i, f, g, o = jnp.split(gates, 4, axis=-1)
        c = jax.nn.sigmoid(f) * c + jax.nn.sigmoid(i) * jnp.tanh(g)
        h = jax.nn.sigmoid(o) * jnp.tanh(c)
        return (h, c), h

    (h, c), ys = jax.lax.scan(step, (h, c), x)
    out = ys.reshape(S * B, H) @ params["w_dense"].T + params["b_dense"]
    return out, (h[None], c[None])


def make_params(key, vocab_size, hidden_size):
    ks = jax.random.split(key, 6)
    scale = 1.0 / jnp.sqrt(hidden_size)
    u = lambda k, shp: jax.random.uniform(k, shp, jnp.float32, -scale, scale)
    return {
        "vocab_size": vocab_size,
        "hidden_size": hidden_size,
        "w_ih": u(ks[0], (4 * hidden_size, vocab_size)),
        "w_hh": u(ks[1], (4 * hidden_size, hidden_size)),
        "b_ih": u(ks[2], (4 * hidden_size,)),
        "b_hh": u(ks[3], (4 * hidden_size,)),
        "w_dense": u(ks[4], (vocab_size, hidden_size)),
        "b_dense": u(ks[5], (vocab_size,)),
    }


if __name__ == "__main__":
    BATCH, SEQ, VOCAB, HIDDEN = 8, 8, 32, 32

    key = jax.random.PRNGKey(0)
    k_par, k_inp = jax.random.split(key)
    params = make_params(k_par, VOCAB, HIDDEN)
    inputs = jax.random.randint(k_inp, (BATCH, SEQ), 0, VOCAB, dtype=jnp.int32)

    output, (h_n, c_n) = rnn_model_forward(inputs, params, state=None)
    jax.block_until_ready((output, h_n, c_n))

    ref_out, (ref_h, ref_c) = reference_forward(inputs, params, state=None)
    assert output.shape == (SEQ * BATCH, VOCAB)
    assert h_n.shape == (1, BATCH, HIDDEN) and c_n.shape == (1, BATCH, HIDDEN)
    assert jnp.allclose(output, ref_out, atol=1e-3, rtol=1e-3)
    assert jnp.allclose(h_n, ref_h, atol=1e-3, rtol=1e-3)
    assert jnp.allclose(c_n, ref_c, atol=1e-3, rtol=1e-3)

    print("KERNEL_OK")
</pallas_src>

<mosaic_0001>
module attributes {stable_mosaic.version = 11 : i64} {
  func.func @lstm_recurrent_kernel(%arg0: i32, %arg1: memref<8x8x128xf32, #tpu.memory_space<vmem>>, %arg2: memref<32x128xf32, #tpu.memory_space<vmem>>, %arg3: memref<8x32xf32, #tpu.memory_space<vmem>>, %arg4: memref<8x32xf32, #tpu.memory_space<vmem>>, %arg5: memref<8x8x32xf32, #tpu.memory_space<vmem>>, %arg6: memref<8x32xf32, #tpu.memory_space<vmem>>, %arg7: memref<8x32xf32, #tpu.memory_space<vmem>>, %arg8: memref<8x32xf32, #tpu.memory_space<vmem>>, %arg9: memref<8x32xf32, #tpu.memory_space<vmem>>) attributes {dimension_semantics = [#tpu.dimension_semantics<arbitrary>], iteration_bounds = array<i64: 1>, scalar_prefetch = 0 : i64, scratch_operands = 2 : i64, tpu.core_type = #tpu.core_type<tc>, window_params = [{transform_indices = @transform_0, window_bounds = array<i64: 8, 8, 128>}, {pipeline_mode = #tpu.pipeline_mode<synchronous>, transform_indices = @transform_1, window_bounds = array<i64: 32, 128>}, {pipeline_mode = #tpu.pipeline_mode<synchronous>, transform_indices = @transform_2, window_bounds = array<i64: 8, 32>}, {pipeline_mode = #tpu.pipeline_mode<synchronous>, transform_indices = @transform_3, window_bounds = array<i64: 8, 32>}, {transform_indices = @transform_4, window_bounds = array<i64: 8, 8, 32>}, {pipeline_mode = #tpu.pipeline_mode<synchronous>, transform_indices = @transform_5, window_bounds = array<i64: 8, 32>}, {pipeline_mode = #tpu.pipeline_mode<synchronous>, transform_indices = @transform_6, window_bounds = array<i64: 8, 32>}]} {
    %c0_i32 = arith.constant 0 : i32
    %0 = arith.cmpi eq, %arg0, %c0_i32 : i32
    %1 = arith.extui %0 : i1 to i32
    %c0_i32_0 = arith.constant 0 : i32
    %2 = arith.cmpi ne, %1, %c0_i32_0 : i32
    scf.if %2 {
      %c0_76 = arith.constant 0 : index
      %c0_77 = arith.constant 0 : index
      %283 = vector.load %arg3[%c0_76, %c0_77] : memref<8x32xf32, #tpu.memory_space<vmem>>, vector<8x32xf32>
      %c0_78 = arith.constant 0 : index
      %c0_79 = arith.constant 0 : index
      %284 = vector.load %arg8[%c0_78, %c0_79] : memref<8x32xf32, #tpu.memory_space<vmem>>, vector<8x32xf32>
      tpu.vector_store %arg8[%c0_78, %c0_79], %283 {strides = array<i32>} : memref<8x32xf32, #tpu.memory_space<vmem>>, vector<8x32xf32>,
      %c0_80 = arith.constant 0 : index
      %c0_81 = arith.constant 0 : index
      %285 = vector.load %arg4[%c0_80, %c0_81] : memref<8x32xf32, #tpu.memory_space<vmem>>, vector<8x32xf32>
      %c0_82 = arith.constant 0 : index
      %c0_83 = arith.constant 0 : index
      %286 = vector.load %arg9[%c0_82, %c0_83] : memref<8x32xf32, #tpu.memory_space<vmem>>, vector<8x32xf32>
      tpu.vector_store %arg9[%c0_82, %c0_83], %285 {strides = array<i32>} : memref<8x32xf32, #tpu.memory_space<vmem>>, vector<8x32xf32>,
    } else {
    }
    %c0 = arith.constant 0 : index
    %c0_1 = arith.constant 0 : index
    %3 = vector.load %arg2[%c0, %c0_1] : memref<32x128xf32, #tpu.memory_space<vmem>>, vector<32x128xf32>
    %c0_2 = arith.constant 0 : index
    %c0_3 = arith.constant 0 : index
    %4 = vector.load %arg8[%c0_2, %c0_3] : memref<8x32xf32, #tpu.memory_space<vmem>>, vector<8x32xf32>
    %c0_4 = arith.constant 0 : index
    %c0_5 = arith.constant 0 : index
    %5 = vector.load %arg9[%c0_4, %c0_5] : memref<8x32xf32, #tpu.memory_space<vmem>>, vector<8x32xf32>
    %c0_i32_6 = arith.constant 0 : i32
    %6 = arith.index_cast %c0_i32_6 : i32 to index
    %c0_7 = arith.constant 0 : index
    %c0_8 = arith.constant 0 : index
    %7 = vector.load %arg1[%6, %c0_7, %c0_8] : memref<8x8x128xf32, #tpu.memory_space<vmem>>, vector<1x8x128xf32>
    %8 = vector.shape_cast %7 : vector<1x8x128xf32> to vector<8x128xf32>
    %cst = arith.constant dense<0.000000e+00> : vector<8x128xf32>
    %9 = tpu.matmul %4, %3, %cst {dimension_numbers = #tpu.dot_dimension_numbers<[1], [0], [0], [1], [0, 0, 1, 1], [], []>} : vector<8x32xf32>, vector<32x128xf32>, vector<8x128xf32> -> vector<8x128xf32>
    %10 = arith.addf %8, %9 : vector<8x128xf32>
    %11 = vector.extract_strided_slice %10 {offsets = [0, 0], sizes = [8, 32], strides = [1, 1]} : vector<8x128xf32> to vector<8x32xf32>
    %12 = arith.negf %11 : vector<8x32xf32>
    %13 = math.exp %12 : vector<8x32xf32>
    %cst_9 = arith.constant 1.000000e+00 : f32
    %14 = vector.broadcast %cst_9 : f32 to vector<8x32xf32>
    %15 = arith.addf %14, %13 : vector<8x32xf32>
    %16 = arith.divf %14, %15 : vector<8x32xf32>
    %17 = vector.extract_strided_slice %10 {offsets = [0, 32], sizes = [8, 32], strides = [1, 1]} : vector<8x128xf32> to vector<8x32xf32>
    %18 = arith.negf %17 : vector<8x32xf32>
    %19 = math.exp %18 : vector<8x32xf32>
    %cst_10 = arith.constant 1.000000e+00 : f32
    %20 = vector.broadcast %cst_10 : f32 to vector<8x32xf32>
    %21 = arith.addf %20, %19 : vector<8x32xf32>
    %22 = arith.divf %20, %21 : vector<8x32xf32>
    %23 = vector.extract_strided_slice %10 {offsets = [0, 64], sizes = [8, 32], strides = [1, 1]} : vector<8x128xf32> to vector<8x32xf32>
    %24 = math.tanh %23 : vector<8x32xf32>
    %25 = vector.extract_strided_slice %10 {offsets = [0, 96], sizes = [8, 32], strides = [1, 1]} : vector<8x128xf32> to vector<8x32xf32>
    %26 = arith.negf %25 : vector<8x32xf32>
    %27 = math.exp %26 : vector<8x32xf32>
    %cst_11 = arith.constant 1.000000e+00 : f32
    %28 = vector.broadcast %cst_11 : f32 to vector<8x32xf32>
    %29 = arith.addf %28, %27 : vector<8x32xf32>
    %30 = arith.divf %28, %29 : vector<8x32xf32>
    %31 = arith.mulf %22, %5 : vector<8x32xf32>
    %32 = arith.mulf %16, %24 : vector<8x32xf32>
    %33 = arith.addf %31, %32 : vector<8x32xf32>
    %34 = math.tanh %33 : vector<8x32xf32>
    %35 = arith.mulf %30, %34 : vector<8x32xf32>
    %36 = arith.index_cast %c0_i32_6 : i32 to index
    %c0_12 = arith.constant 0 : index
    %c0_13 = arith.constant 0 : index
    %37 = vector.load %arg5[%36, %c0_12, %c0_13] : memref<8x8x32xf32, #tpu.memory_space<vmem>>, vector<1x8x32xf32>
    %38 = vector.shape_cast %37 : vector<1x8x32xf32> to vector<8x32xf32>
    %39 = vector.shape_cast %35 : vector<8x32xf32> to vector<1x8x32xf32>
    tpu.vector_store %arg5[%36, %c0_12, %c0_13], %39 {strides = array<i32>} : memref<8x8x32xf32, #tpu.memory_space<vmem>>, vector<1x8x32xf32>,
    %c1_i32 = arith.constant 1 : i32
    %40 = arith.index_cast %c1_i32 : i32 to index
    %c0_14 = arith.constant 0 : index
    %c0_15 = arith.constant 0 : index
    %41 = vector.load %arg1[%40, %c0_14, %c0_15] : memref<8x8x128xf32, #tpu.memory_space<vmem>>, vector<1x8x128xf32>
    %42 = vector.shape_cast %41 : vector<1x8x128xf32> to vector<8x128xf32>
    %cst_16 = arith.constant dense<0.000000e+00> : vector<8x128xf32>
    %43 = tpu.matmul %35, %3, %cst_16 {dimension_numbers = #tpu.dot_dimension_numbers<[1], [0], [0], [1], [0, 0, 1, 1], [], []>} : vector<8x32xf32>, vector<32x128xf32>, vector<8x128xf32> -> vector<8x128xf32>
    %44 = arith.addf %42, %43 : vector<8x128xf32>
    %45 = vector.extract_strided_slice %44 {offsets = [0, 0], sizes = [8, 32], strides = [1, 1]} : vector<8x128xf32> to vector<8x32xf32>
    %46 = arith.negf %45 : vector<8x32xf32>
    %47 = math.exp %46 : vector<8x32xf32>
    %cst_17 = arith.constant 1.000000e+00 : f32
    %48 = vector.broadcast %cst_17 : f32 to vector<8x32xf32>
    %49 = arith.addf %48, %47 : vector<8x32xf32>
    %50 = arith.divf %48, %49 : vector<8x32xf32>
    %51 = vector.extract_strided_slice %44 {offsets = [0, 32], sizes = [8, 32], strides = [1, 1]} : vector<8x128xf32> to vector<8x32xf32>
    %52 = arith.negf %51 : vector<8x32xf32>
    %53 = math.exp %52 : vector<8x32xf32>
    %cst_18 = arith.constant 1.000000e+00 : f32
    %54 = vector.broadcast %cst_18 : f32 to vector<8x32xf32>
    %55 = arith.addf %54, %53 : vector<8x32xf32>
    %56 = arith.divf %54, %55 : vector<8x32xf32>
    %57 = vector.extract_strided_slice %44 {offsets = [0, 64], sizes = [8, 32], strides = [1, 1]} : vector<8x128xf32> to vector<8x32xf32>
    %58 = math.tanh %57 : vector<8x32xf32>
    %59 = vector.extract_strided_slice %44 {offsets = [0, 96], sizes = [8, 32], strides = [1, 1]} : vector<8x128xf32> to vector<8x32xf32>
    %60 = arith.negf %59 : vector<8x32xf32>
    %61 = math.exp %60 : vector<8x32xf32>
    %cst_19 = arith.constant 1.000000e+00 : f32
    %62 = vector.broadcast %cst_19 : f32 to vector<8x32xf32>
    %63 = arith.addf %62, %61 : vector<8x32xf32>
    %64 = arith.divf %62, %63 : vector<8x32xf32>
    %65 = arith.mulf %56, %33 : vector<8x32xf32>
    %66 = arith.mulf %50, %58 : vector<8x32xf32>
    %67 = arith.addf %65, %66 : vector<8x32xf32>
    %68 = math.tanh %67 : vector<8x32xf32>
    %69 = arith.mulf %64, %68 : vector<8x32xf32>
    %70 = arith.index_cast %c1_i32 : i32 to index
    %c0_20 = arith.constant 0 : index
    %c0_21 = arith.constant 0 : index
    %71 = vector.load %arg5[%70, %c0_20, %c0_21] : memref<8x8x32xf32, #tpu.memory_space<vmem>>, vector<1x8x32xf32>
    %72 = vector.shape_cast %71 : vector<1x8x32xf32> to vector<8x32xf32>
    %73 = vector.shape_cast %69 : vector<8x32xf32> to vector<1x8x32xf32>
    tpu.vector_store %arg5[%70, %c0_20, %c0_21], %73 {strides = array<i32>} : memref<8x8x32xf32, #tpu.memory_space<vmem>>, vector<1x8x32xf32>,
    %c2_i32 = arith.constant 2 : i32
    %74 = arith.index_cast %c2_i32 : i32 to index
    %c0_22 = arith.constant 0 : index
    %c0_23 = arith.constant 0 : index
    %75 = vector.load %arg1[%74, %c0_22, %c0_23] : memref<8x8x128xf32, #tpu.memory_space<vmem>>, vector<1x8x128xf32>
    %76 = vector.shape_cast %75 : vector<1x8x128xf32> to vector<8x128xf32>
    %cst_24 = arith.constant dense<0.000000e+00> : vector<8x128xf32>
    %77 = tpu.matmul %69, %3, %cst_24 {dimension_numbers = #tpu.dot_dimension_numbers<[1], [0], [0], [1], [0, 0, 1, 1], [], []>} : vector<8x32xf32>, vector<32x128xf32>, vector<8x128xf32> -> vector<8x128xf32>
    %78 = arith.addf %76, %77 : vector<8x128xf32>
    %79 = vector.extract_strided_slice %78 {offsets = [0, 0], sizes = [8, 32], strides = [1, 1]} : vector<8x128xf32> to vector<8x32xf32>
    %80 = arith.negf %79 : vector<8x32xf32>
    %81 = math.exp %80 : vector<8x32xf32>
    %cst_25 = arith.constant 1.000000e+00 : f32
    %82 = vector.broadcast %cst_25 : f32 to vector<8x32xf32>
    %83 = arith.addf %82, %81 : vector<8x32xf32>
    %84 = arith.divf %82, %83 : vector<8x32xf32>
    %85 = vector.extract_strided_slice %78 {offsets = [0, 32], sizes = [8, 32], strides = [1, 1]} : vector<8x128xf32> to vector<8x32xf32>
    %86 = arith.negf %85 : vector<8x32xf32>
    %87 = math.exp %86 : vector<8x32xf32>
    %cst_26 = arith.constant 1.000000e+00 : f32
    %88 = vector.broadcast %cst_26 : f32 to vector<8x32xf32>
    %89 = arith.addf %88, %87 : vector<8x32xf32>
    %90 = arith.divf %88, %89 : vector<8x32xf32>
    %91 = vector.extract_strided_slice %78 {offsets = [0, 64], sizes = [8, 32], strides = [1, 1]} : vector<8x128xf32> to vector<8x32xf32>
    %92 = math.tanh %91 : vector<8x32xf32>
    %93 = vector.extract_strided_slice %78 {offsets = [0, 96], sizes = [8, 32], strides = [1, 1]} : vector<8x128xf32> to vector<8x32xf32>
    %94 = arith.negf %93 : vector<8x32xf32>
    %95 = math.exp %94 : vector<8x32xf32>
    %cst_27 = arith.constant 1.000000e+00 : f32
    %96 = vector.broadcast %cst_27 : f32 to vector<8x32xf32>
    %97 = arith.addf %96, %95 : vector<8x32xf32>
    %98 = arith.divf %96, %97 : vector<8x32xf32>
    %99 = arith.mulf %90, %67 : vector<8x32xf32>
    %100 = arith.mulf %84, %92 : vector<8x32xf32>
    %101 = arith.addf %99, %100 : vector<8x32xf32>
    %102 = math.tanh %101 : vector<8x32xf32>
    %103 = arith.mulf %98, %102 : vector<8x32xf32>
    %104 = arith.index_cast %c2_i32 : i32 to index
    %c0_28 = arith.constant 0 : index
    %c0_29 = arith.constant 0 : index
    %105 = vector.load %arg5[%104, %c0_28, %c0_29] : memref<8x8x32xf32, #tpu.memory_space<vmem>>, vector<1x8x32xf32>
    %106 = vector.shape_cast %105 : vector<1x8x32xf32> to vector<8x32xf32>
    %107 = vector.shape_cast %103 : vector<8x32xf32> to vector<1x8x32xf32>
    tpu.vector_store %arg5[%104, %c0_28, %c0_29], %107 {strides = array<i32>} : memref<8x8x32xf32, #tpu.memory_space<vmem>>, vector<1x8x32xf32>,
    %c3_i32 = arith.constant 3 : i32
    %108 = arith.index_cast %c3_i32 : i32 to index
    %c0_30 = arith.constant 0 : index
    %c0_31 = arith.constant 0 : index
    %109 = vector.load %arg1[%108, %c0_30, %c0_31] : memref<8x8x128xf32, #tpu.memory_space<vmem>>, vector<1x8x128xf32>
    %110 = vector.shape_cast %109 : vector<1x8x128xf32> to vector<8x128xf32>
    %cst_32 = arith.constant dense<0.000000e+00> : vector<8x128xf32>
    %111 = tpu.matmul %103, %3, %cst_32 {dimension_numbers = #tpu.dot_dimension_numbers<[1], [0], [0], [1], [0, 0, 1, 1], [], []>} : vector<8x32xf32>, vector<32x128xf32>, vector<8x128xf32> -> vector<8x128xf32>
    %112 = arith.addf %110, %111 : vector<8x128xf32>
    %113 = vector.extract_strided_slice %112 {offsets = [0, 0], sizes = [8, 32], strides = [1, 1]} : vector<8x128xf32> to vector<8x32xf32>
    %114 = arith.negf %113 : vector<8x32xf32>
    %115 = math.exp %114 : vector<8x32xf32>
    %cst_33 = arith.constant 1.000000e+00 : f32
    %116 = vector.broadcast %cst_33 : f32 to vector<8x32xf32>
    %117 = arith.addf %116, %115 : vector<8x32xf32>
    %118 = arith.divf %116, %117 : vector<8x32xf32>
    %119 = vector.extract_strided_slice %112 {offsets = [0, 32], sizes = [8, 32], strides = [1, 1]} : vector<8x128xf32> to vector<8x32xf32>
    %120 = arith.negf %119 : vector<8x32xf32>
    %121 = math.exp %120 : vector<8x32xf32>
    %cst_34 = arith.constant 1.000000e+00 : f32
    %122 = vector.broadcast %cst_34 : f32 to vector<8x32xf32>
    %123 = arith.addf %122, %121 : vector<8x32xf32>
    %124 = arith.divf %122, %123 : vector<8x32xf32>
    %125 = vector.extract_strided_slice %112 {offsets = [0, 64], sizes = [8, 32], strides = [1, 1]} : vector<8x128xf32> to vector<8x32xf32>
    %126 = math.tanh %125 : vector<8x32xf32>
    %127 = vector.extract_strided_slice %112 {offsets = [0, 96], sizes = [8, 32], strides = [1, 1]} : vector<8x128xf32> to vector<8x32xf32>
    %128 = arith.negf %127 : vector<8x32xf32>
    %129 = math.exp %128 : vector<8x32xf32>
    %cst_35 = arith.constant 1.000000e+00 : f32
    %130 = vector.broadcast %cst_35 : f32 to vector<8x32xf32>
    %131 = arith.addf %130, %129 : vector<8x32xf32>
    %132 = arith.divf %130, %131 : vector<8x32xf32>
    %133 = arith.mulf %124, %101 : vector<8x32xf32>
    %134 = arith.mulf %118, %126 : vector<8x32xf32>
    %135 = arith.addf %133, %134 : vector<8x32xf32>
    %136 = math.tanh %135 : vector<8x32xf32>
    %137 = arith.mulf %132, %136 : vector<8x32xf32>
    %138 = arith.index_cast %c3_i32 : i32 to index
    %c0_36 = arith.constant 0 : index
    %c0_37 = arith.constant 0 : index
    %139 = vector.load %arg5[%138, %c0_36, %c0_37] : memref<8x8x32xf32, #tpu.memory_space<vmem>>, vector<1x8x32xf32>
    %140 = vector.shape_cast %139 : vector<1x8x32xf32> to vector<8x32xf32>
    %141 = vector.shape_cast %137 : vector<8x32xf32> to vector<1x8x32xf32>
    tpu.vector_store %arg5[%138, %c0_36, %c0_37], %141 {strides = array<i32>} : memref<8x8x32xf32, #tpu.memory_space<vmem>>, vector<1x8x32xf32>,
    %c4_i32 = arith.constant 4 : i32
    %142 = arith.index_cast %c4_i32 : i32 to index
    %c0_38 = arith.constant 0 : index
    %c0_39 = arith.constant 0 : index
    %143 = vector.load %arg1[%142, %c0_38, %c0_39] : memref<8x8x128xf32, #tpu.memory_space<vmem>>, vector<1x8x128xf32>
    %144 = vector.shape_cast %143 : vector<1x8x128xf32> to vector<8x128xf32>
    %cst_40 = arith.constant dense<0.000000e+00> : vector<8x128xf32>
    %145 = tpu.matmul %137, %3, %cst_40 {dimension_numbers = #tpu.dot_dimension_numbers<[1], [0], [0], [1], [0, 0, 1, 1], [], []>} : vector<8x32xf32>, vector<32x128xf32>, vector<8x128xf32> -> vector<8x128xf32>
    %146 = arith.addf %144, %145 : vector<8x128xf32>
    %147 = vector.extract_strided_slice %146 {offsets = [0, 0], sizes = [8, 32], strides = [1, 1]} : vector<8x128xf32> to vector<8x32xf32>
    %148 = arith.negf %147 : vector<8x32xf32>
    %149 = math.exp %148 : vector<8x32xf32>
    %cst_41 = arith.constant 1.000000e+00 : f32
    %150 = vector.broadcast %cst_41 : f32 to vector<8x32xf32>
    %151 = arith.addf %150, %149 : vector<8x32xf32>
    %152 = arith.divf %150, %151 : vector<8x32xf32>
    %153 = vector.extract_strided_slice %146 {offsets = [0, 32], sizes = [8, 32], strides = [1, 1]} : vector<8x128xf32> to vector<8x32xf32>
    %154 = arith.negf %153 : vector<8x32xf32>
    %155 = math.exp %154 : vector<8x32xf32>
    %cst_42 = arith.constant 1.000000e+00 : f32
    %156 = vector.broadcast %cst_42 : f32 to vector<8x32xf32>
    %157 = arith.addf %156, %155 : vector<8x32xf32>
    %158 = arith.divf %156, %157 : vector<8x32xf32>
    %159 = vector.extract_strided_slice %146 {offsets = [0, 64], sizes = [8, 32], strides = [1, 1]} : vector<8x128xf32> to vector<8x32xf32>
    %160 = math.tanh %159 : vector<8x32xf32>
    %161 = vector.extract_strided_slice %146 {offsets = [0, 96], sizes = [8, 32], strides = [1, 1]} : vector<8x128xf32> to vector<8x32xf32>
    %162 = arith.negf %161 : vector<8x32xf32>
    %163 = math.exp %162 : vector<8x32xf32>
    %cst_43 = arith.constant 1.000000e+00 : f32
    %164 = vector.broadcast %cst_43 : f32 to vector<8x32xf32>
    %165 = arith.addf %164, %163 : vector<8x32xf32>
    %166 = arith.divf %164, %165 : vector<8x32xf32>
    %167 = arith.mulf %158, %135 : vector<8x32xf32>
    %168 = arith.mulf %152, %160 : vector<8x32xf32>
    %169 = arith.addf %167, %168 : vector<8x32xf32>
    %170 = math.tanh %169 : vector<8x32xf32>
    %171 = arith.mulf %166, %170 : vector<8x32xf32>
    %172 = arith.index_cast %c4_i32 : i32 to index
    %c0_44 = arith.constant 0 : index
    %c0_45 = arith.constant 0 : index
    %173 = vector.load %arg5[%172, %c0_44, %c0_45] : memref<8x8x32xf32, #tpu.memory_space<vmem>>, vector<1x8x32xf32>
    %174 = vector.shape_cast %173 : vector<1x8x32xf32> to vector<8x32xf32>
    %175 = vector.shape_cast %171 : vector<8x32xf32> to vector<1x8x32xf32>
    tpu.vector_store %arg5[%172, %c0_44, %c0_45], %175 {strides = array<i32>} : memref<8x8x32xf32, #tpu.memory_space<vmem>>, vector<1x8x32xf32>,
    %c5_i32 = arith.constant 5 : i32
    %176 = arith.index_cast %c5_i32 : i32 to index
    %c0_46 = arith.constant 0 : index
    %c0_47 = arith.constant 0 : index
    %177 = vector.load %arg1[%176, %c0_46, %c0_47] : memref<8x8x128xf32, #tpu.memory_space<vmem>>, vector<1x8x128xf32>
    %178 = vector.shape_cast %177 : vector<1x8x128xf32> to vector<8x128xf32>
    %cst_48 = arith.constant dense<0.000000e+00> : vector<8x128xf32>
    %179 = tpu.matmul %171, %3, %cst_48 {dimension_numbers = #tpu.dot_dimension_numbers<[1], [0], [0], [1], [0, 0, 1, 1], [], []>} : vector<8x32xf32>, vector<32x128xf32>, vector<8x128xf32> -> vector<8x128xf32>
    %180 = arith.addf %178, %179 : vector<8x128xf32>
    %181 = vector.extract_strided_slice %180 {offsets = [0, 0], sizes = [8, 32], strides = [1, 1]} : vector<8x128xf32> to vector<8x32xf32>
    %182 = arith.negf %181 : vector<8x32xf32>
    %183 = math.exp %182 : vector<8x32xf32>
    %cst_49 = arith.constant 1.000000e+00 : f32
    %184 = vector.broadcast %cst_49 : f32 to vector<8x32xf32>
    %185 = arith.addf %184, %183 : vector<8x32xf32>
    %186 = arith.divf %184, %185 : vector<8x32xf32>
    %187 = vector.extract_strided_slice %180 {offsets = [0, 32], sizes = [8, 32], strides = [1, 1]} : vector<8x128xf32> to vector<8x32xf32>
    %188 = arith.negf %187 : vector<8x32xf32>
    %189 = math.exp %188 : vector<8x32xf32>
    %cst_50 = arith.constant 1.000000e+00 : f32
    %190 = vector.broadcast %cst_50 : f32 to vector<8x32xf32>
    %191 = arith.addf %190, %189 : vector<8x32xf32>
    %192 = arith.divf %190, %191 : vector<8x32xf32>
    %193 = vector.extract_strided_slice %180 {offsets = [0, 64], sizes = [8, 32], strides = [1, 1]} : vector<8x128xf32> to vector<8x32xf32>
    %194 = math.tanh %193 : vector<8x32xf32>
    %195 = vector.extract_strided_slice %180 {offsets = [0, 96], sizes = [8, 32], strides = [1, 1]} : vector<8x128xf32> to vector<8x32xf32>
    %196 = arith.negf %195 : vector<8x32xf32>
    %197 = math.exp %196 : vector<8x32xf32>
    %cst_51 = arith.constant 1.000000e+00 : f32
    %198 = vector.broadcast %cst_51 : f32 to vector<8x32xf32>
    %199 = arith.addf %198, %197 : vector<8x32xf32>
    %200 = arith.divf %198, %199 : vector<8x32xf32>
    %201 = arith.mulf %192, %169 : vector<8x32xf32>
    %202 = arith.mulf %186, %194 : vector<8x32xf32>
    %203 = arith.addf %201, %202 : vector<8x32xf32>
    %204 = math.tanh %203 : vector<8x32xf32>
    %205 = arith.mulf %200, %204 : vector<8x32xf32>
    %206 = arith.index_cast %c5_i32 : i32 to index
    %c0_52 = arith.constant 0 : index
    %c0_53 = arith.constant 0 : index
    %207 = vector.load %arg5[%206, %c0_52, %c0_53] : memref<8x8x32xf32, #tpu.memory_space<vmem>>, vector<1x8x32xf32>
    %208 = vector.shape_cast %207 : vector<1x8x32xf32> to vector<8x32xf32>
    %209 = vector.shape_cast %205 : vector<8x32xf32> to vector<1x8x32xf32>
    tpu.vector_store %arg5[%206, %c0_52, %c0_53], %209 {strides = array<i32>} : memref<8x8x32xf32, #tpu.memory_space<vmem>>, vector<1x8x32xf32>,
    %c6_i32 = arith.constant 6 : i32
    %210 = arith.index_cast %c6_i32 : i32 to index
    %c0_54 = arith.constant 0 : index
    %c0_55 = arith.constant 0 : index
    %211 = vector.load %arg1[%210, %c0_54, %c0_55] : memref<8x8x128xf32, #tpu.memory_space<vmem>>, vector<1x8x128xf32>
    %212 = vector.shape_cast %211 : vector<1x8x128xf32> to vector<8x128xf32>
    %cst_56 = arith.constant dense<0.000000e+00> : vector<8x128xf32>
    %213 = tpu.matmul %205, %3, %cst_56 {dimension_numbers = #tpu.dot_dimension_numbers<[1], [0], [0], [1], [0, 0, 1, 1], [], []>} : vector<8x32xf32>, vector<32x128xf32>, vector<8x128xf32> -> vector<8x128xf32>
    %214 = arith.addf %212, %213 : vector<8x128xf32>
    %215 = vector.extract_strided_slice %214 {offsets = [0, 0], sizes = [8, 32], strides = [1, 1]} : vector<8x128xf32> to vector<8x32xf32>
    %216 = arith.negf %215 : vector<8x32xf32>
    %217 = math.exp %216 : vector<8x32xf32>
    %cst_57 = arith.constant 1.000000e+00 : f32
    %218 = vector.broadcast %cst_57 : f32 to vector<8x32xf32>
    %219 = arith.addf %218, %217 : vector<8x32xf32>
    %220 = arith.divf %218, %219 : vector<8x32xf32>
    %221 = vector.extract_strided_slice %214 {offsets = [0, 32], sizes = [8, 32], strides = [1, 1]} : vector<8x128xf32> to vector<8x32xf32>
    %222 = arith.negf %221 : vector<8x32xf32>
    %223 = math.exp %222 : vector<8x32xf32>
    %cst_58 = arith.constant 1.000000e+00 : f32
    %224 = vector.broadcast %cst_58 : f32 to vector<8x32xf32>
    %225 = arith.addf %224, %223 : vector<8x32xf32>
    %226 = arith.divf %224, %225 : vector<8x32xf32>
    %227 = vector.extract_strided_slice %214 {offsets = [0, 64], sizes = [8, 32], strides = [1, 1]} : vector<8x128xf32> to vector<8x32xf32>
    %228 = math.tanh %227 : vector<8x32xf32>
    %229 = vector.extract_strided_slice %214 {offsets = [0, 96], sizes = [8, 32], strides = [1, 1]} : vector<8x128xf32> to vector<8x32xf32>
    %230 = arith.negf %229 : vector<8x32xf32>
    %231 = math.exp %230 : vector<8x32xf32>
    %cst_59 = arith.constant 1.000000e+00 : f32
    %232 = vector.broadcast %cst_59 : f32 to vector<8x32xf32>
    %233 = arith.addf %232, %231 : vector<8x32xf32>
    %234 = arith.divf %232, %233 : vector<8x32xf32>
    %235 = arith.mulf %226, %203 : vector<8x32xf32>
    %236 = arith.mulf %220, %228 : vector<8x32xf32>
    %237 = arith.addf %235, %236 : vector<8x32xf32>
    %238 = math.tanh %237 : vector<8x32xf32>
    %239 = arith.mulf %234, %238 : vector<8x32xf32>
    %240 = arith.index_cast %c6_i32 : i32 to index
    %c0_60 = arith.constant 0 : index
    %c0_61 = arith.constant 0 : index
    %241 = vector.load %arg5[%240, %c0_60, %c0_61] : memref<8x8x32xf32, #tpu.memory_space<vmem>>, vector<1x8x32xf32>
    %242 = vector.shape_cast %241 : vector<1x8x32xf32> to vector<8x32xf32>
    %243 = vector.shape_cast %239 : vector<8x32xf32> to vector<1x8x32xf32>
    tpu.vector_store %arg5[%240, %c0_60, %c0_61], %243 {strides = array<i32>} : memref<8x8x32xf32, #tpu.memory_space<vmem>>, vector<1x8x32xf32>,
    %c7_i32 = arith.constant 7 : i32
    %244 = arith.index_cast %c7_i32 : i32 to index
    %c0_62 = arith.constant 0 : index
    %c0_63 = arith.constant 0 : index
    %245 = vector.load %arg1[%244, %c0_62, %c0_63] : memref<8x8x128xf32, #tpu.memory_space<vmem>>, vector<1x8x128xf32>
    %246 = vector.shape_cast %245 : vector<1x8x128xf32> to vector<8x128xf32>
    %cst_64 = arith.constant dense<0.000000e+00> : vector<8x128xf32>
    %247 = tpu.matmul %239, %3, %cst_64 {dimension_numbers = #tpu.dot_dimension_numbers<[1], [0], [0], [1], [0, 0, 1, 1], [], []>} : vector<8x32xf32>, vector<32x128xf32>, vector<8x128xf32> -> vector<8x128xf32>
    %248 = arith.addf %246, %247 : vector<8x128xf32>
    %249 = vector.extract_strided_slice %248 {offsets = [0, 0], sizes = [8, 32], strides = [1, 1]} : vector<8x128xf32> to vector<8x32xf32>
    %250 = arith.negf %249 : vector<8x32xf32>
    %251 = math.exp %250 : vector<8x32xf32>
    %cst_65 = arith.constant 1.000000e+00 : f32
    %252 = vector.broadcast %cst_65 : f32 to vector<8x32xf32>
    %253 = arith.addf %252, %251 : vector<8x32xf32>
    %254 = arith.divf %252, %253 : vector<8x32xf32>
    %255 = vector.extract_strided_slice %248 {offsets = [0, 32], sizes = [8, 32], strides = [1, 1]} : vector<8x128xf32> to vector<8x32xf32>
    %256 = arith.negf %255 : vector<8x32xf32>
    %257 = math.exp %256 : vector<8x32xf32>
    %cst_66 = arith.constant 1.000000e+00 : f32
    %258 = vector.broadcast %cst_66 : f32 to vector<8x32xf32>
    %259 = arith.addf %258, %257 : vector<8x32xf32>
    %260 = arith.divf %258, %259 : vector<8x32xf32>
    %261 = vector.extract_strided_slice %248 {offsets = [0, 64], sizes = [8, 32], strides = [1, 1]} : vector<8x128xf32> to vector<8x32xf32>
    %262 = math.tanh %261 : vector<8x32xf32>
    %263 = vector.extract_strided_slice %248 {offsets = [0, 96], sizes = [8, 32], strides = [1, 1]} : vector<8x128xf32> to vector<8x32xf32>
    %264 = arith.negf %263 : vector<8x32xf32>
    %265 = math.exp %264 : vector<8x32xf32>
    %cst_67 = arith.constant 1.000000e+00 : f32
    %266 = vector.broadcast %cst_67 : f32 to vector<8x32xf32>
    %267 = arith.addf %266, %265 : vector<8x32xf32>
    %268 = arith.divf %266, %267 : vector<8x32xf32>
    %269 = arith.mulf %260, %237 : vector<8x32xf32>
    %270 = arith.mulf %254, %262 : vector<8x32xf32>
    %271 = arith.addf %269, %270 : vector<8x32xf32>
    %272 = math.tanh %271 : vector<8x32xf32>
    %273 = arith.mulf %268, %272 : vector<8x32xf32>
    %274 = arith.index_cast %c7_i32 : i32 to index
    %c0_68 = arith.constant 0 : index
    %c0_69 = arith.constant 0 : index
    %275 = vector.load %arg5[%274, %c0_68, %c0_69] : memref<8x8x32xf32, #tpu.memory_space<vmem>>, vector<1x8x32xf32>
    %276 = vector.shape_cast %275 : vector<1x8x32xf32> to vector<8x32xf32>
    %277 = vector.shape_cast %273 : vector<8x32xf32> to vector<1x8x32xf32>
    tpu.vector_store %arg5[%274, %c0_68, %c0_69], %277 {strides = array<i32>} : memref<8x8x32xf32, #tpu.memory_space<vmem>>, vector<1x8x32xf32>,
    %c8_i32 = arith.constant 8 : i32
    %c0_70 = arith.constant 0 : index
    %c0_71 = arith.constant 0 : index
    %278 = vector.load %arg8[%c0_70, %c0_71] : memref<8x32xf32, #tpu.memory_space<vmem>>, vector<8x32xf32>
    tpu.vector_store %arg8[%c0_70, %c0_71], %273 {strides = array<i32>} : memref<8x32xf32, #tpu.memory_space<vmem>>, vector<8x32xf32>,
    %c0_72 = arith.constant 0 : index
    %c0_73 = arith.constant 0 : index
    %279 = vector.load %arg9[%c0_72, %c0_73] : memref<8x32xf32, #tpu.memory_space<vmem>>, vector<8x32xf32>
    tpu.vector_store %arg9[%c0_72, %c0_73], %271 {strides = array<i32>} : memref<8x32xf32, #tpu.memory_space<vmem>>, vector<8x32xf32>,
    %c0_i32_74 = arith.constant 0 : i32
    %280 = arith.cmpi eq, %arg0, %c0_i32_74 : i32
    %281 = arith.extui %280 : i1 to i32
    %c0_i32_75 = arith.constant 0 : i32
    %282 = arith.cmpi ne, %281, %c0_i32_75 : i32
    scf.if %282 {
      %c0_76 = arith.constant 0 : index
      %c0_77 = arith.constant 0 : index
      %283 = vector.load %arg6[%c0_76, %c0_77] : memref<8x32xf32, #tpu.memory_space<vmem>>, vector<8x32xf32>
      tpu.vector_store %arg6[%c0_76, %c0_77], %273 {strides = array<i32>} : memref<8x32xf32, #tpu.memory_space<vmem>>, vector<8x32xf32>,
      %c0_78 = arith.constant 0 : index
      %c0_79 = arith.constant 0 : index
      %284 = vector.load %arg7[%c0_78, %c0_79] : memref<8x32xf32, #tpu.memory_space<vmem>>, vector<8x32xf32>
      tpu.vector_store %arg7[%c0_78, %c0_79], %271 {strides = array<i32>} : memref<8x32xf32, #tpu.memory_space<vmem>>, vector<8x32xf32>,
    } else {
    }
    return
  }
  func.func @transform_0(%arg0: i32) -> (i32, i32, i32) {
    %c0_i32 = arith.constant 0 : i32
    %c0_i32_0 = arith.constant 0 : i32
    %c0_i32_1 = arith.constant 0 : i32
    return %arg0, %c0_i32, %c0_i32_0 : i32, i32, i32
  }
  func.func @transform_1(%arg0: i32) -> (i32, i32) {
    %c0_i32 = arith.constant 0 : i32
    %c0_i32_0 = arith.constant 0 : i32
    %c0_i32_1 = arith.constant 0 : i32
    return %c0_i32, %c0_i32_0 : i32, i32
  }
  func.func @transform_2(%arg0: i32) -> (i32, i32) {
    %c0_i32 = arith.constant 0 : i32
    %c0_i32_0 = arith.constant 0 : i32
    %c0_i32_1 = arith.constant 0 : i32
    return %c0_i32, %c0_i32_0 : i32, i32
  }
  func.func @transform_3(%arg0: i32) -> (i32, i32) {
    %c0_i32 = arith.constant 0 : i32
    %c0_i32_0 = arith.constant 0 : i32
    %c0_i32_1 = arith.constant 0 : i32
    return %c0_i32, %c0_i32_0 : i32, i32
  }
  func.func @transform_4(%arg0: i32) -> (i32, i32, i32) {
    %c0_i32 = arith.constant 0 : i32
    %c0_i32_0 = arith.constant 0 : i32
    %c0_i32_1 = arith.constant 0 : i32
    return %arg0, %c0_i32, %c0_i32_0 : i32, i32, i32
  }
  func.func @transform_5(%arg0: i32) -> (i32, i32) {
    %c0_i32 = arith.constant 0 : i32
    %c0_i32_0 = arith.constant 0 : i32
    %c0_i32_1 = arith.constant 0 : i32
    return %c0_i32, %c0_i32_0 : i32, i32
  }
  func.func @transform_6(%arg0: i32) -> (i32, i32) {
    %c0_i32 = arith.constant 0 : i32
    %c0_i32_0 = arith.constant 0 : i32
    %c0_i32_1 = arith.constant 0 : i32
    return %c0_i32, %c0_i32_0 : i32, i32
  }
}

</mosaic_0001>

<bundles_post_ra>
// kernel: tpu_custom_call.1
= control target key start
LH: loop header
LB: loop body
LE: loop exit
PB: predicated region body
PF: predicated region fallthrough
CT: control target
= control target key end

     0   :  { %12 = vsyncpa [#allocation5], 0  ;;  %s1583_s0 = inlined_call_operand.hbm [shape: f32[8,8,128], index: 0, kind: input, shape index: {}]   ;;  %s1584_s1 = inlined_call_operand.hbm [shape: f32[32,128], index: 1, kind: input, shape index: {}]   ;;  %s1585_s2 = inlined_call_operand.hbm [shape: f32[8,32], index: 2, kind: input, shape index: {}]   ;;  %s1586_s3 = inlined_call_operand.hbm [shape: f32[8,32], index: 3, kind: input, shape index: {}]   ;;  %s1587_s4 = inlined_call_operand.hbm [shape: f32[8,8,32], index: 4, kind: output, shape index: {0}]   ;;  %s1588_s5 = inlined_call_operand.hbm [shape: f32[8,32], index: 5, kind: output, shape index: {1}]   ;;  %s1589_s6 = inlined_call_operand.hbm [shape: f32[8,32], index: 6, kind: output, shape index: {2}]  }
   0x1   :  { %13 = vsyncpa [#allocation8], 0 }
   0x2   :  { %14 = vsyncpa [#allocation11], 0 }
   0x3   :  { %15 = vsyncpa [#allocation6], 0 }
   0x4   :  { %16 = vsyncpa [#allocation14], 0  ;;  %s1361_s21 = smov [#allocation7]   ;;  %s1362_s23 = smov [#allocation4]  }
   0x5   :  { %s34_s22 = sshll.u32 %s1361_s21, 4  ;;  %s22_s24 = sshll.u32 %s1362_s23, 4  ;;  %s35_s22 = int_to_ptr.vmem [resolvable:$true] %s34_s22  ;;  %s23_s24 = int_to_ptr.vmem [resolvable:$true] %s22_s24 }
   0x6   :  { %s1219_s25 = scalar_lea.vmem %s35_s22, 512  ;;  %p1224_p1 = scmp.lt.s32.totalorder %s35_s22, %s35_s22 }
   0x7   :  { %p1220_p0 = scmp.ne.s32.totalorder %s35_s22, %s1219_s25  ;;  %p1225_p2 = scmp.lt.s32.totalorder %s1219_s25, %s1219_s25 }
   0x9   :  { %p1226_p3 = por %p1225_p2, %p1224_p1 }
   0xb   :  { %p1227_p4 = pnand %p1226_p3, %p1220_p0 }
   0xd   :  { %1230 = shalt.err (!%p1227_p4)
}
   0xe   :  { %s1363_s26 = smov 128   ;;  %s1364_s27 = smov 8  }
   0xf   :  { %40 = dma.hbm_to_vmem [thread:$0]  %s1584_s1, 512, %s35_s22, [#allocation8], %s1363_s26, %s1363_s26, %s1364_s27  }
  0x10   :  { %s1239_s30 = scalar_lea.vmem %s23_s24, 1024  ;;  %p1244_p6 = scmp.lt.s32.totalorder %s23_s24, %s23_s24 }
  0x11   :  { %p1240_p5 = scmp.ne.s32.totalorder %s23_s24, %s1239_s30  ;;  %p1245_p7 = scmp.lt.s32.totalorder %s1239_s30, %s1239_s30 }
  0x13   :  { %p1246_p8 = por %p1245_p7, %p1244_p6 }
  0x15   :  { %p1247_p9 = pnand %p1246_p8, %p1240_p5 }
  0x17   :  { %1250 = shalt.err (!%p1247_p9)
}
  0x18   :  { %28 = dma.hbm_to_vmem [thread:$0]  %s1583_s0, 1024, %s23_s24, [#allocation5], %s1363_s26, %s1363_s26, %s1364_s27  }
  0x19   :  { %s1365_s9 = smov [#allocation9]   ;;  %s1366_s11 = smov [#allocation10]  }
  0x1a   :  { %s47_s10 = sshll.u32 %s1365_s9, 4  ;;  %s57_s12 = sshll.u32 %s1366_s11, 4  ;;  %s48_s10 = int_to_ptr.vmem [resolvable:$true] %s47_s10  ;;  %s58_s12 = int_to_ptr.vmem [resolvable:$true] %s57_s12 }
  0x1b   :  { %s1259_s1 = scalar_lea.vmem %s48_s10, 128  ;;  %p1264_p11 = scmp.lt.s32.totalorder %s48_s10, %s48_s10 }
  0x1c   :  { %p1260_p10 = scmp.ne.s32.totalorder %s48_s10, %s1259_s1  ;;  %p1265_p12 = scmp.lt.s32.totalorder %s1259_s1, %s1259_s1 }
  0x1e   :  { %p1266_p13 = por %p1265_p12, %p1264_p11 }
  0x20   :  { %p1267_p0 = pnand %p1266_p13, %p1260_p10 }
  0x22   :  { %1270 = shalt.err (!%p1267_p0)
}
  0x23   :  { %50 = dma.hbm_to_vmem [thread:$0]  %s1585_s2, 128, %s48_s10, [#allocation8]  }
  0x24   :  { %s1279_s15 = scalar_lea.vmem %s58_s12, 128  ;;  %p1284_p2 = scmp.lt.s32.totalorder %s58_s12, %s58_s12 }
  0x25   :  { %p1280_p1 = scmp.ne.s32.totalorder %s58_s12, %s1279_s15  ;;  %p1285_p3 = scmp.lt.s32.totalorder %s1279_s15, %s1279_s15 }
  0x27   :  { %p1286_p4 = por %p1285_p3, %p1284_p2 }
  0x29   :  { %p1287_p5 = pnand %p1286_p4, %p1280_p1 }
  0x2b   :  { %1290 = shalt.err (!%p1287_p5)
}
  0x2c   :  { %60 = dma.hbm_to_vmem [thread:$0]  %s1586_s3, 128, %s58_s12, [#allocation11]  }
  0x2d   :  { %1351 = dma.done.wait [#allocation5], 1024  }
  0x2e   :  { %1352 = vsyncadd [#allocation5], 4294966272 }
  0x2f   :  { %1353 = dma.done.wait [#allocation8], 640  }
  0x30   :  { %1354 = vsyncadd [#allocation8], 4294966656 }
  0x31   :  { %1355 = dma.done.wait [#allocation11], 128  }
  0x32   :  { %1356 = vsyncadd [#allocation11], 4294967168  ;;  %v1367_v0 = vmov 0.0   ;;  %vm1368_vm0 = vmmov 0   ;;  %vm78_vm1 = vcmask 261120   ;;  %v1434_v1 = vld [vmem:[#allocation7 + $0x18] sm:$0xff] }
  0x33   :  { %1045 = vmatprep.subr.mxu0 %v1367_v0  ;;  %1053 = vmatprep.mubr.msk.f32.mxu0 %vm1368_vm0, %v1367_v0  ;;  %v1436_v2 = vld [vmem:[#allocation7 + $0x10] sm:$0xff]  ;;  %v77_v3 = vld [vmem:[#allocation9] sm:$0xff]  ;;  %v1441_v4 = vld [vmem:[#allocation7 + $0x8] sm:$0xff]  ;;  %s1369_s2 = smov 64   ;;  %s1370_s3 = smov 32  }
  0x34   :  { %1056 = vmatprep.subr.mxu1 %v1367_v0  ;;  %1064 = vmatprep.mubr.msk.f32.mxu1 %vm1368_vm0, %v1367_v0  ;;  %79 = vst.msk [vmem:[#allocation2] sm:$0xff] %vm78_vm1, %v77_v3  ;;  %v1448_v5 = vld [vmem:[#allocation7] sm:$0xff]  ;;  %v80_v7 = vld [vmem:[#allocation10] sm:$0xff]  ;;  %v303_v46 = vld [vmem:[#allocation4 + $0x10] sm:$0xff]  ;;  %s1371_s17 = smov 96   ;;  %s1372_s18 = smov [#allocation13]  }
  0x35   :  { %1046 = vmatpush3.msra.mxu0 %v1434_v1  ;;  %1057 = vmatpush3.msra.mxu1 %v1434_v1  ;;  %81 = vst.msk [vmem:[#allocation3] sm:$0xff] %vm78_vm1, %v80_v7  ;;  %v88_v8 = vld [vmem:[#allocation4] sm:$0xff]  ;;  %v198_v28 = vld [vmem:[#allocation4 + $0x8] sm:$0xff]  ;;  %v408_v3 = vld [vmem:[#allocation4 + $0x18] sm:$0xff]  ;;  %s961_s19 = sshll.u32 %s1372_s18, 4  ;;  %s1373_s20 = smov [#allocation12]   ;;  %s962_s19 = int_to_ptr.vmem [resolvable:$true] %s961_s19 }
  0x36   :  { %1047 = vmatprep.subr.mxu0 %v1367_v0  ;;  %1058 = vmatprep.subr.mxu1 %v1367_v0  ;;  %s948_s21 = sshll.u32 %s1373_s20, 4  ;;  %s1374_s22 = smov [#allocation15]   ;;  %s949_s21 = int_to_ptr.vmem [resolvable:$true] %s948_s21 }
  0x37   :  { %1048 = vmatpush3.msra.mxu0 %v1436_v2  ;;  %1059 = vmatpush3.msra.mxu1 %v1436_v2  ;;  %s971_s23 = sshll.u32 %s1374_s22, 4  ;;  %s1291_s24 = scalar_lea.vmem %s962_s19, 128  ;;  %s972_s23 = int_to_ptr.vmem [resolvable:$true] %s971_s23 }
  0x38   :  { %1049 = vmatprep.subr.mxu0 %v1367_v0  ;;  %1060 = vmatprep.subr.mxu1 %v1367_v0  ;;  %p1292_p6 = scmp.ne.s32.totalorder %s962_s19, %s1291_s24  ;;  %p1296_p7 = scmp.lt.s32.totalorder %s962_s19, %s962_s19 }
  0x39   :  { %1050 = vmatpush3.msra.mxu0 %v1441_v4  ;;  %1061 = vmatpush3.msra.mxu1 %v1441_v4  ;;  %p1297_p8 = scmp.lt.s32.totalorder %s1291_s24, %s1291_s24 }
  0x3a   :  { %1051 = vmatprep.subr.mxu0 %v1367_v0  ;;  %1062 = vmatprep.subr.mxu1 %v1367_v0 }
  0x3b   :  { %1052 = vmatpush3.msra.mxu0 %v1448_v5  ;;  %1063 = vmatpush3.msra.mxu1 %v1448_v5  ;;  %v86_v6 = vld [vmem:[#allocation2] sm:$0xff]  ;;  %p1298_p9 = por %p1297_p8, %p1296_p7 }
  0x3c   :  { %1067 = vmatprep.subr.mxu0 %v1367_v0  ;;  %1078 = vmatprep.subr.mxu1 %v1367_v0  ;;  %v87_v13 = vld [vmem:[#allocation3] sm:$0xff] }
  0x3d   :  { %1054 = vmatmul.mubr.msk.f32.vlgmr.msra.gmra.mxu0 %vm78_vm1, %v86_v6  ;;  %p1299_p10 = pnand %p1298_p9, %p1292_p6 }
  0x3e   :  { %1068 = vmatpush3.msra.mxu0 %v1434_v1  ;;  %1075 = vmatprep.mubr.msk.f32.mxu0 %vm1368_vm0, %v1367_v0 }
  0x3f   :  { %1069 = vmatprep.subr.mxu0 %v1367_v0 }
  0x40   :  { %1070 = vmatpush3.msra.mxu0 %v1436_v2 }
  0x41   :  { %1071 = vmatprep.subr.mxu0 %v1367_v0 }
  0x42   :  { %1072 = vmatpush3.msra.mxu0 %v1441_v4 }
  0x43   :  { %1073 = vmatprep.subr.mxu0 %v1367_v0 }
  0x44   :  { %1074 = vmatpush3.msra.mxu0 %v1448_v5 }
  0x45   :  { %1089 = vmatprep.subr.mxu0 %v1367_v0 }
  0xfd   :  { %v159_v9 = vpop.f32.mrf.mxu0 }
  0xfe   :  { %v163_v10 = vadd.f32 %v159_v9, %v88_v8 }
  0xff   :  { %v1055_v11 = vpop.f32.mrf.mxu0 }
 0x100   :  { %1147 = vtanh.f32 %v163_v10  ;;  %v990_v14 = vmul.f32 -1.442695, %v163_v10 }
 0x102   :  { %1149 = vpow2.f32 %v990_v14 }
 0x10d   :  { %v1148_v12 = vpop.eup %1147 }
 0x10e   :  { %177 = vrot.lane.b32.xlu0 %v1148_v12, %s1369_s2 }
 0x10f   :  { %v1150_v15 = vpop.eup %1149 }
 0x110   :  { %v167_v16 = vadd.f32 1.0, %v1150_v15 }
 0x112   :  { %172 = vrot.lane.b32.xlu0 %v87_v13, %s1370_s3  ;;  %1151 = vrcp.f32 %v167_v16 }
 0x11f   :  { %v1152_v17 = vpop.eup %1151 }
 0x180   :  { %v178_v18 = vpop.permute.xlu0 %177 }
 0x181   :  { %v180_v19 = vmul.f32 %v1152_v17, %v178_v18 }
 0x183   :  { %182 = vrot.lane.b32.xlu1 %v180_v19, %s1370_s3 }
 0x184   :  { %v173_v20 = vpop.permute.xlu0 %172 }
 0x185   :  { %v175_v21 = vmul.f32 %v1152_v17, %v173_v20 }
 0x1f5   :  { %v183_v22 = vpop.permute.xlu1 %182 }
 0x1f6   :  { %v185_v23 = vadd.f32 %v183_v22, %v175_v21 }
 0x1f8   :  { %1153 = vtanh.f32 %v185_v23 }
 0x205   :  { %v1154_v24 = vpop.eup %1153 }
 0x206   :  { %188 = vrot.lane.b32.xlu1 %v1154_v24, %s1369_s2 }
 0x278   :  { %v189_v25 = vpop.permute.xlu1 %188 }
 0x279   :  { %v191_v26 = vmul.f32 %v1152_v17, %v189_v25 }
 0x27b   :  { %193 = vrot.lane.b32.xlu0 %v191_v26, %s1370_s3 }
 0x2ed   :  { %v194_v27 = vpop.permute.xlu0 %193 }
 0x2ee   :  { %196 = vst.msk [vmem:[#allocation12] sm:$0xff] %vm78_vm1, %v194_v27  ;;  %1065 = vmatmul.mubr.msk.f32.vlgmr.msra.gmra.mxu1 %vm78_vm1, %v194_v27 }
 0x2ef   :  { %1079 = vmatpush3.msra.mxu1 %v1434_v1  ;;  %1086 = vmatprep.mubr.msk.f32.mxu1 %vm1368_vm0, %v1367_v0 }
 0x2f0   :  { %1080 = vmatprep.subr.mxu1 %v1367_v0 }
 0x2f1   :  { %1081 = vmatpush3.msra.mxu1 %v1436_v2 }
 0x2f2   :  { %1082 = vmatprep.subr.mxu1 %v1367_v0 }
 0x2f3   :  { %1083 = vmatpush3.msra.mxu1 %v1441_v4 }
 0x2f4   :  { %1084 = vmatprep.subr.mxu1 %v1367_v0 }
 0x2f5   :  { %1085 = vmatpush3.msra.mxu1 %v1448_v5 }
 0x2f6   :  { %1100 = vmatprep.subr.mxu1 %v1367_v0 }
 0x3ae   :  { %v267_v29 = vpop.f32.mrf.mxu1 }
 0x3af   :  { %v271_v30 = vadd.f32 %v267_v29, %v198_v28 }
 0x3b0   :  { %v1066_v31 = vpop.f32.mrf.mxu1 }
 0x3b1   :  { %1155 = vtanh.f32 %v271_v30  ;;  %v992_v33 = vmul.f32 -1.442695, %v271_v30 }
 0x3b3   :  { %1157 = vpow2.f32 %v992_v33 }
 0x3be   :  { %v1156_v32 = vpop.eup %1155 }
 0x3bf   :  { %281 = vrot.lane.b32.xlu1 %v1156_v32, %s1369_s2 }
 0x3c0   :  { %v1158_v34 = vpop.eup %1157 }
 0x3c1   :  { %v275_v35 = vadd.f32 1.0, %v1158_v34 }
 0x3c3   :  { %1159 = vrcp.f32 %v275_v35 }
 0x3d0   :  { %v1160_v36 = vpop.eup %1159 }
 0x3d1   :  { %v279_v39 = vmul.f32 %v1160_v36, %v185_v23  ;;  %v513_v23 = vld [vmem:[#allocation4 + $0x20] sm:$0xff] }
 0x431   :  { %v282_v37 = vpop.permute.xlu1 %281 }
 0x432   :  { %v284_v38 = vmul.f32 %v1160_v36, %v282_v37 }
 0x434   :  { %286 = vrot.lane.b32.xlu0 %v284_v38, %s1370_s3 }
 0x4a6   :  { %v287_v40 = vpop.permute.xlu0 %286 }
 0x4a7   :  { %v289_v41 = vadd.f32 %v287_v40, %v279_v39 }
 0x4a9   :  { %1161 = vtanh.f32 %v289_v41 }
 0x4b6   :  { %v1162_v42 = vpop.eup %1161 }
 0x4b7   :  { %292 = vrot.lane.b32.xlu1 %v1162_v42, %s1369_s2 }
 0x529   :  { %v293_v43 = vpop.permute.xlu1 %292 }
 0x52a   :  { %v295_v44 = vmul.f32 %v1160_v36, %v293_v43 }
 0x52c   :  { %297 = vrot.lane.b32.xlu0 %v295_v44, %s1370_s3 }
 0x59e   :  { %v298_v45 = vpop.permute.xlu0 %297 }
 0x59f   :  { %301 = vst.msk [vmem:[#allocation12 + $0x8] sm:$0xff] %vm78_vm1, %v298_v45  ;;  %1076 = vmatmul.mubr.msk.f32.vlgmr.msra.gmra.mxu0 %vm78_vm1, %v298_v45 }
 0x5a0   :  { %1090 = vmatpush3.msra.mxu0 %v1434_v1  ;;  %1097 = vmatprep.mubr.msk.f32.mxu0 %vm1368_vm0, %v1367_v0 }
 0x5a1   :  { %1091 = vmatprep.subr.mxu0 %v1367_v0 }
 0x5a2   :  { %1092 = vmatpush3.msra.mxu0 %v1436_v2 }
 0x5a3   :  { %1093 = vmatprep.subr.mxu0 %v1367_v0 }
 0x5a4   :  { %1094 = vmatpush3.msra.mxu0 %v1441_v4 }
 0x5a5   :  { %1095 = vmatprep.subr.mxu0 %v1367_v0 }
 0x5a6   :  { %1096 = vmatpush3.msra.mxu0 %v1448_v5 }
 0x5a7   :  { %1111 = vmatprep.subr.mxu0 %v1367_v0 }
 0x65f   :  { %v372_v47 = vpop.f32.mrf.mxu0 }
 0x660   :  { %v376_v48 = vadd.f32 %v372_v47, %v303_v46 }
 0x661   :  { %v1077_v49 = vpop.f32.mrf.mxu0 }
 0x662   :  { %1163 = vtanh.f32 %v376_v48  ;;  %v994_v51 = vmul.f32 -1.442695, %v376_v48 }
 0x664   :  { %1165 = vpow2.f32 %v994_v51 }
 0x66f   :  { %v1164_v50 = vpop.eup %1163 }
 0x670   :  { %386 = vrot.lane.b32.xlu1 %v1164_v50, %s1369_s2 }
 0x671   :  { %v1166_v52 = vpop.eup %1165 }
 0x672   :  { %v380_v53 = vadd.f32 1.0, %v1166_v52 }
 0x674   :  { %1167 = vrcp.f32 %v380_v53 }
 0x681   :  { %v1168_v54 = vpop.eup %1167 }
 0x682   :  { %v384_v57 = vmul.f32 %v1168_v54, %v289_v41  ;;  %v618_v41 = vld [vmem:[#allocation4 + $0x28] sm:$0xff] }
 0x6e2   :  { %v387_v55 = vpop.permute.xlu1 %386 }
 0x6e3   :  { %v389_v56 = vmul.f32 %v1168_v54, %v387_v55 }
 0x6e5   :  { %391 = vrot.lane.b32.xlu0 %v389_v56, %s1370_s3 }
 0x757   :  { %v392_v58 = vpop.permute.xlu0 %391 }
 0x758   :  { %v394_v59 = vadd.f32 %v392_v58, %v384_v57 }
 0x75a   :  { %1169 = vtanh.f32 %v394_v59 }
 0x767   :  { %v1170_v60 = vpop.eup %1169 }
 0x768   :  { %397 = vrot.lane.b32.xlu1 %v1170_v60, %s1369_s2 }
 0x7da   :  { %v398_v61 = vpop.permute.xlu1 %397 }
 0x7db   :  { %v400_v62 = vmul.f32 %v1168_v54, %v398_v61  ;;  %v723_v54 = vld [vmem:[#allocation4 + $0x30] sm:$0xff] }
 0x7dd   :  { %402 = vrot.lane.b32.xlu0 %v400_v62, %s1370_s3 }
 0x84f   :  { %v403_v63 = vpop.permute.xlu0 %402 }
 0x850   :  { %406 = vst.msk [vmem:[#allocation12 + $0x10] sm:$0xff] %vm78_vm1, %v403_v63  ;;  %1087 = vmatmul.mubr.msk.f32.vlgmr.msra.gmra.mxu1 %vm78_vm1, %v403_v63 }
 0x851   :  { %1101 = vmatpush3.msra.mxu1 %v1434_v1  ;;  %1108 = vmatprep.mubr.msk.f32.mxu1 %vm1368_vm0, %v1367_v0 }
 0x852   :  { %1102 = vmatprep.subr.mxu1 %v1367_v0 }
 0x853   :  { %1103 = vmatpush3.msra.mxu1 %v1436_v2 }
 0x854   :  { %1104 = vmatprep.subr.mxu1 %v1367_v0 }
 0x855   :  { %1105 = vmatpush3.msra.mxu1 %v1441_v4 }
 0x856   :  { %1106 = vmatprep.subr.mxu1 %v1367_v0 }
 0x857   :  { %1107 = vmatpush3.msra.mxu1 %v1448_v5 }
 0x858   :  { %1122 = vmatprep.subr.mxu1 %v1367_v0 }
 0x910   :  { %v477_v6 = vpop.f32.mrf.mxu1 }
 0x911   :  { %v481_v7 = vadd.f32 %v477_v6, %v408_v3 }
 0x912   :  { %v1088_v8 = vpop.f32.mrf.mxu1 }
 0x913   :  { %1171 = vtanh.f32 %v481_v7  ;;  %v996_v10 = vmul.f32 -1.442695, %v481_v7 }
 0x915   :  { %1173 = vpow2.f32 %v996_v10 }
 0x920   :  { %v1172_v9 = vpop.eup %1171 }
 0x921   :  { %491 = vrot.lane.b32.xlu1 %v1172_v9, %s1369_s2 }
 0x922   :  { %v1174_v11 = vpop.eup %1173 }
 0x923   :  { %v485_v12 = vadd.f32 1.0, %v1174_v11 }
 0x925   :  { %1175 = vrcp.f32 %v485_v12 }
 0x932   :  { %v1176_v13 = vpop.eup %1175 }
 0x933   :  { %v489_v16 = vmul.f32 %v1176_v13, %v394_v59 }
 0x993   :  { %v492_v14 = vpop.permute.xlu1 %491 }
 0x994   :  { %v494_v15 = vmul.f32 %v1176_v13, %v492_v14 }
 0x996   :  { %496 = vrot.lane.b32.xlu0 %v494_v15, %s1370_s3 }
 0xa08   :  { %v497_v17 = vpop.permute.xlu0 %496 }
 0xa09   :  { %v499_v18 = vadd.f32 %v497_v17, %v489_v16 }
 0xa0b   :  { %1177 = vtanh.f32 %v499_v18 }
 0xa18   :  { %v1178_v19 = vpop.eup %1177 }
 0xa19   :  { %502 = vrot.lane.b32.xlu1 %v1178_v19, %s1369_s2 }
 0xa8b   :  { %v503_v20 = vpop.permute.xlu1 %502 }
 0xa8c   :  { %v505_v21 = vmul.f32 %v1176_v13, %v503_v20  ;;  %v828_v13 = vld [vmem:[#allocation4 + $0x38] sm:$0xff] }
 0xa8e   :  { %507 = vrot.lane.b32.xlu0 %v505_v21, %s1370_s3 }
 0xb00   :  { %v508_v22 = vpop.permute.xlu0 %507 }
 0xb01   :  { %511 = vst.msk [vmem:[#allocation12 + $0x18] sm:$0xff] %vm78_vm1, %v508_v22  ;;  %1098 = vmatmul.mubr.msk.f32.vlgmr.msra.gmra.mxu0 %vm78_vm1, %v508_v22 }
 0xb02   :  { %1112 = vmatpush3.msra.mxu0 %v1434_v1  ;;  %1119 = vmatprep.mubr.msk.f32.mxu0 %vm1368_vm0, %v1367_v0 }
 0xb03   :  { %1113 = vmatprep.subr.mxu0 %v1367_v0 }
 0xb04   :  { %1114 = vmatpush3.msra.mxu0 %v1436_v2 }
 0xb05   :  { %1115 = vmatprep.subr.mxu0 %v1367_v0 }
 0xb06   :  { %1116 = vmatpush3.msra.mxu0 %v1441_v4 }
 0xb07   :  { %1117 = vmatprep.subr.mxu0 %v1367_v0 }
 0xb08   :  { %1118 = vmatpush3.msra.mxu0 %v1448_v5 }
 0xbc1   :  { %v582_v24 = vpop.f32.mrf.mxu0 }
 0xbc2   :  { %v586_v25 = vadd.f32 %v582_v24, %v513_v23 }
 0xbc3   :  { %v1099_v26 = vpop.f32.mrf.mxu0 }
 0xbc4   :  { %1179 = vtanh.f32 %v586_v25  ;;  %v998_v28 = vmul.f32 -1.442695, %v586_v25 }
 0xbc6   :  { %1181 = vpow2.f32 %v998_v28 }
 0xbd1   :  { %v1180_v27 = vpop.eup %1179 }
 0xbd2   :  { %596 = vrot.lane.b32.xlu1 %v1180_v27, %s1369_s2 }
 0xbd3   :  { %v1182_v29 = vpop.eup %1181 }
 0xbd4   :  { %v590_v30 = vadd.f32 1.0, %v1182_v29 }
 0xbd6   :  { %1183 = vrcp.f32 %v590_v30 }
 0xbe3   :  { %v1184_v31 = vpop.eup %1183 }
 0xbe4   :  { %v594_v34 = vmul.f32 %v1184_v31, %v499_v18 }
 0xc44   :  { %v597_v32 = vpop.permute.xlu1 %596 }
 0xc45   :  { %v599_v33 = vmul.f32 %v1184_v31, %v597_v32 }
 0xc47   :  { %601 = vrot.lane.b32.xlu0 %v599_v33, %s1370_s3 }
 0xcb9   :  { %v602_v35 = vpop.permute.xlu0 %601 }
 0xcba   :  { %v604_v36 = vadd.f32 %v602_v35, %v594_v34 }
 0xcbc   :  { %1185 = vtanh.f32 %v604_v36 }
 0xcc9   :  { %v1186_v37 = vpop.eup %1185 }
 0xcca   :  { %607 = vrot.lane.b32.xlu1 %v1186_v37, %s1369_s2 }
 0xd3c   :  { %v608_v38 = vpop.permute.xlu1 %607 }
 0xd3d   :  { %v610_v39 = vmul.f32 %v1184_v31, %v608_v38 }
 0xd3f   :  { %612 = vrot.lane.b32.xlu0 %v610_v39, %s1370_s3 }
 0xdb1   :  { %v613_v40 = vpop.permute.xlu0 %612 }
 0xdb2   :  { %616 = vst.msk [vmem:[#allocation12 + $0x20] sm:$0xff] %vm78_vm1, %v613_v40  ;;  %1109 = vmatmul.mubr.msk.f32.vlgmr.msra.gmra.mxu1 %vm78_vm1, %v613_v40 }
 0xdb3   :  { %1123 = vmatpush3.msra.mxu1 %v1434_v1  ;;  %1130 = vmatprep.mubr.msk.f32.mxu1 %vm1368_vm0, %v1367_v0 }
 0xdb4   :  { %1124 = vmatprep.subr.mxu1 %v1367_v0 }
 0xdb5   :  { %1125 = vmatpush3.msra.mxu1 %v1436_v2 }
 0xdb6   :  { %1126 = vmatprep.subr.mxu1 %v1367_v0 }
 0xdb7   :  { %1127 = vmatpush3.msra.mxu1 %v1441_v4 }
 0xdb8   :  { %1128 = vmatprep.subr.mxu1 %v1367_v0 }
 0xdb9   :  { %1129 = vmatpush3.msra.mxu1 %v1448_v5 }
 0xe72   :  { %v687_v42 = vpop.f32.mrf.mxu1 }
 0xe73   :  { %v691_v43 = vadd.f32 %v687_v42, %v618_v41 }
 0xe74   :  { %v1110_v44 = vpop.f32.mrf.mxu1 }
 0xe75   :  { %1187 = vtanh.f32 %v691_v43  ;;  %v1000_v45 = vmul.f32 -1.442695, %v691_v43 }
 0xe77   :  { %1189 = vpow2.f32 %v1000_v45 }
 0xe82   :  { %v1188_v1 = vpop.eup %1187 }
 0xe83   :  { %701 = vrot.lane.b32.xlu1 %v1188_v1, %s1369_s2 }
 0xe84   :  { %v1190_v46 = vpop.eup %1189 }
 0xe85   :  { %v695_v2 = vadd.f32 1.0, %v1190_v46 }
 0xe87   :  { %1191 = vrcp.f32 %v695_v2 }
 0xe94   :  { %v1192_v47 = vpop.eup %1191 }
 0xe95   :  { %v699_v0 = vmul.f32 %v1192_v47, %v604_v36 }
 0xef5   :  { %v702_v48 = vpop.permute.xlu1 %701 }
 0xef6   :  { %v704_v4 = vmul.f32 %v1192_v47, %v702_v48 }
 0xef8   :  { %706 = vrot.lane.b32.xlu0 %v704_v4, %s1370_s3 }
 0xf6a   :  { %v707_v5 = vpop.permute.xlu0 %706 }
 0xf6b   :  { %v709_v49 = vadd.f32 %v707_v5, %v699_v0 }
 0xf6d   :  { %1193 = vtanh.f32 %v709_v49 }
 0xf7a   :  { %v1194_v50 = vpop.eup %1193 }
 0xf7b   :  { %712 = vrot.lane.b32.xlu1 %v1194_v50, %s1369_s2 }
 0xfed   :  { %v713_v51 = vpop.permute.xlu1 %712 }
 0xfee   :  { %v715_v52 = vmul.f32 %v1192_v47, %v713_v51 }
 0xff0   :  { %717 = vrot.lane.b32.xlu0 %v715_v52, %s1370_s3 }
0x1062   :  { %v718_v53 = vpop.permute.xlu0 %717 }
0x1063   :  { %721 = vst.msk [vmem:[#allocation12 + $0x28] sm:$0xff] %vm78_vm1, %v718_v53  ;;  %1120 = vmatmul.mubr.msk.f32.vlgmr.msra.gmra.mxu0 %vm78_vm1, %v718_v53 }
0x1123   :  { %v792_v55 = vpop.f32.mrf.mxu0 }
0x1124   :  { %v796_v56 = vadd.f32 %v792_v55, %v723_v54 }
0x1125   :  { %v1121_v57 = vpop.f32.mrf.mxu0 }
0x1126   :  { %1195 = vtanh.f32 %v796_v56  ;;  %v1002_v59 = vmul.f32 -1.442695, %v796_v56 }
0x1128   :  { %1197 = vpow2.f32 %v1002_v59 }
0x1133   :  { %v1196_v58 = vpop.eup %1195 }
0x1134   :  { %806 = vrot.lane.b32.xlu1 %v1196_v58, %s1369_s2 }
0x1135   :  { %v1198_v60 = vpop.eup %1197 }
0x1136   :  { %v800_v61 = vadd.f32 1.0, %v1198_v60 }
0x1138   :  { %1199 = vrcp.f32 %v800_v61 }
0x1145   :  { %v1200_v62 = vpop.eup %1199 }
0x1146   :  { %v804_v6 = vmul.f32 %v1200_v62, %v709_v49 }
0x11a6   :  { %v807_v63 = vpop.permute.xlu1 %806 }
0x11a7   :  { %v809_v3 = vmul.f32 %v1200_v62, %v807_v63 }
0x11a9   :  { %811 = vrot.lane.b32.xlu0 %v809_v3, %s1370_s3 }
0x121b   :  { %v812_v7 = vpop.permute.xlu0 %811 }
0x121c   :  { %v814_v8 = vadd.f32 %v812_v7, %v804_v6 }
0x121e   :  { %1201 = vtanh.f32 %v814_v8 }
0x122b   :  { %v1202_v9 = vpop.eup %1201 }
0x122c   :  { %817 = vrot.lane.b32.xlu1 %v1202_v9, %s1369_s2 }
0x129e   :  { %v818_v10 = vpop.permute.xlu1 %817 }
0x129f   :  { %v820_v11 = vmul.f32 %v1200_v62, %v818_v10 }
0x12a1   :  { %822 = vrot.lane.b32.xlu0 %v820_v11, %s1370_s3 }
0x1313   :  { %v823_v12 = vpop.permute.xlu0 %822 }
0x1314   :  { %826 = vst.msk [vmem:[#allocation12 + $0x30] sm:$0xff] %vm78_vm1, %v823_v12  ;;  %1131 = vmatmul.mubr.msk.f32.vlgmr.msra.gmra.mxu1 %vm78_vm1, %v823_v12 }
0x13d4   :  { %v897_v14 = vpop.f32.mrf.mxu1 }
0x13d5   :  { %v901_v15 = vadd.f32 %v897_v14, %v828_v13 }
0x13d6   :  { %v1132_v16 = vpop.f32.mrf.mxu1 }
0x13d7   :  { %1203 = vtanh.f32 %v901_v15  ;;  %v1004_v18 = vmul.f32 -1.442695, %v901_v15 }
0x13d9   :  { %1205 = vpow2.f32 %v1004_v18 }
0x13e4   :  { %v1204_v17 = vpop.eup %1203 }
0x13e5   :  { %911 = vrot.lane.b32.xlu1 %v1204_v17, %s1369_s2 }
0x13e6   :  { %v1206_v19 = vpop.eup %1205 }
0x13e7   :  { %v905_v20 = vadd.f32 1.0, %v1206_v19 }
0x13e9   :  { %1207 = vrcp.f32 %v905_v20 }
0x13f6   :  { %v1208_v21 = vpop.eup %1207 }
0x13f7   :  { %v909_v24 = vmul.f32 %v1208_v21, %v814_v8 }
0x1457   :  { %v912_v22 = vpop.permute.xlu1 %911 }
0x1458   :  { %v914_v23 = vmul.f32 %v1208_v21, %v912_v22 }
0x145a   :  { %916 = vrot.lane.b32.xlu0 %v914_v23, %s1370_s3 }
0x14cc   :  { %v917_v25 = vpop.permute.xlu0 %916 }
0x14cd   :  { %v919_v26 = vadd.f32 %v917_v25, %v909_v24 }
0x14cf   :  { %1209 = vtanh.f32 %v919_v26 }
0x14dc   :  { %v1210_v27 = vpop.eup %1209 }
0x14dd   :  { %922 = vrot.lane.b32.xlu1 %v1210_v27, %s1369_s2 }
0x14e1   :  { %934 = vrot.lane.b32.xlu1 %v919_v26, %s1371_s17 }
0x154f   :  { %v923_v28 = vpop.permute.xlu1 %922 }
0x1550   :  { %v925_v29 = vmul.f32 %v1208_v21, %v923_v28 }
0x1552   :  { %927 = vrot.lane.b32.xlu0 %v925_v29, %s1370_s3 }
0x1553   :  { %v935_v30 = vpop.permute.xlu1 %934 }
0x1554   :  { %937 = vst.msk [vmem:[#allocation3] sm:$0xff] %vm78_vm1, %v935_v30  ;;  %942 = vst.msk [vmem:[#allocation15] sm:$0xff] %vm78_vm1, %v935_v30 }
0x15c4   :  { %v928_v31 = vpop.permute.xlu0 %927 }
0x15c5   :  { %931 = vst.msk [vmem:[#allocation12 + $0x38] sm:$0xff] %vm78_vm1, %v928_v31  ;;  %932 = vst.msk [vmem:[#allocation2] sm:$0xff] %vm78_vm1, %v928_v31 }
0x15c6   :  { %941 = vst.msk [vmem:[#allocation13] sm:$0xff] %vm78_vm1, %v928_v31 }
0x15c7   :  { %1302 = shalt.err (!%p1299_p10)
}
0x15c8   :  { %964 = dma.vmem_to_hbm [thread:$0]  %s962_s19, 128, %s1588_s5, [#allocation14]  }
0x15c9   :  { %s1311_s29 = scalar_lea.vmem %s949_s21, 1024  ;;  %p1316_p12 = scmp.lt.s32.totalorder %s949_s21, %s949_s21 }
0x15ca   :  { %p1312_p11 = scmp.ne.s32.totalorder %s949_s21, %s1311_s29  ;;  %p1317_p13 = scmp.lt.s32.totalorder %s1311_s29, %s1311_s29 }
0x15cc   :  { %p1318_p0 = por %p1317_p13, %p1316_p12 }
0x15ce   :  { %p1319_p1 = pnand %p1318_p0, %p1312_p11 }
0x15d0   :  { %1322 = shalt.err (!%p1319_p1)
}
0x15d1   :  { %954 = dma.vmem_to_hbm [thread:$0]  %s949_s21, 1024, %s1587_s4, [#allocation6], %s1363_s26, %s1363_s26, %s1364_s27  }
0x15d2   :  { %s1331_s8 = scalar_lea.vmem %s972_s23, 128  ;;  %p1336_p3 = scmp.lt.s32.totalorder %s972_s23, %s972_s23 }
0x15d3   :  { %p1332_p2 = scmp.ne.s32.totalorder %s972_s23, %s1331_s8  ;;  %p1337_p4 = scmp.lt.s32.totalorder %s1331_s8, %s1331_s8 }
0x15d5   :  { %p1338_p5 = por %p1337_p4, %p1336_p3 }
0x15d7   :  { %p1339_p6 = pnand %p1338_p5, %p1332_p2 }
0x15d9   :  { %1342 = shalt.err (!%p1339_p6)
}
0x15da   :  { %974 = dma.vmem_to_hbm [thread:$0]  %s972_s23, 128, %s1589_s6, [#allocation14]  }
0x15db   :  { %1357 = dma.done.wait [#allocation6], 1024  }
0x15dc   :  { %1358 = vsyncadd [#allocation6], 4294966272 }
0x15dd   :  { %1359 = dma.done.wait [#allocation14], 256  }
0x15de   :  { %1360 = vsyncadd [#allocation14], 4294967040 }
0x15df   :  { %984 = vsyncpa [#allocation5], 1 }
0x15e0   :  { %985 = vsyncpa [#allocation8], 1 }
0x15e1   :  { %986 = vsyncpa [#allocation11], 1 }
0x15e2   :  { %987 = vsyncpa [#allocation6], 1 }
0x15e3   :  { %988 = vsyncpa [#allocation14], 1 }

</bundles_post_ra>
